<compile_context>
chip_gen: v6e
topology: v6e:2x2x1
jax: 0.10.0
libtpu: 0.0.40
codegen_flags: <defaults>
</compile_context>

<pallas_src>
import functools

import jax
import jax.numpy as jnp
from jax.experimental import pallas as pl
from jax.experimental.pallas import tpu as pltpu


def _fused_conv_kernel(x_ref, w_ref, b_ref, o_ref):
    """One image per grid step.

    x_ref: (1, Ho+1, Wo+1, K)  space-to-depth input, K = 4*Cin
    w_ref: (2, 2, K, Cout)     phase-packed 2x2 weights (zero where kh/kw == 3)
    b_ref: (1, Cout)           bias (f32)
    o_ref: (1, Ho*Wo, Cout)    flattened NHWC output
    """
    _, hh, wh, k = x_ref.shape
    ho, wo = hh - 1, wh - 1
    cout = o_ref.shape[-1]

    # Load once; upcast (possibly bf16-streamed) operands to f32 so all the
    # slicing / flattening / accumulation below runs on 32-bit layouts.
    xv = x_ref[0].astype(jnp.float32)          # (Ho+1, Wo+1, K)
    wv = w_ref[...].astype(jnp.float32)        # (2, 2, K, Cout)

    acc = jnp.zeros((ho * wo, cout), jnp.float32)
    for dh in range(2):                        # fused im2col: 4 accumulating dots
        for dw in range(2):
            tap = xv[dh:dh + ho, dw:dw + wo, :]              # (Ho, Wo, K)
            acc = acc + jnp.dot(tap.reshape(ho * wo, k), wv[dh, dw],
                                preferred_element_type=jnp.float32)
    acc = acc + b_ref[...].astype(jnp.float32)               # (1, Cout) bcast
    o_ref[0] = acc.astype(o_ref.dtype)


@functools.partial(jax.jit, static_argnames=("compute_dtype",))
def downsample_block(x, weight, bias, *, compute_dtype=None):
    """Forward of DownSampleBlock.

    x:      (N, C, H, W)
    weight: (Cout, Cin, 3, 3)  (PyTorch OIHW)
    bias:   (Cout,)
    compute_dtype: dtype used to store/stream the matmul operands
                   (default: x.dtype; jnp.bfloat16 halves HBM traffic on
                   v5e/v6e — accumulation stays in f32).
    returns (N, Cout, Ho, Wo) with Ho = ((H+1) - 3)//2 + 1, Wo likewise.
    """
    N, C, H, W = x.shape
    Cout, Cin, KH, KW = weight.shape
    assert Cin == C and KH == 3 and KW == 3
    if compute_dtype is None:
        compute_dtype = x.dtype
    out_dtype = x.dtype

    Hp, Wp = H + 1, W + 1                 # F.pad(x, (0, 1, 0, 1))
    Ho = (Hp - 3) // 2 + 1
    Wo = (Wp - 3) // 2 + 1
    Hh, Wh = Ho + 1, Wo + 1               # 2x2 space-to-depth cell grid
    K = 4 * C

    # ---- XLA glue: one light pass over the input ---------------------------
    # NCHW -> NHWC, zero-pad bottom/right (covers the module's F.pad plus
    # rounding up to the 2x2 cell grid; the extra rows/cols only ever meet the
    # zero weights below), then 2x2 space-to-depth into the channel axis.
    xh = jnp.transpose(x, (0, 2, 3, 1))
    xh = jnp.pad(xh, ((0, 0), (0, 2 * Hh - H), (0, 2 * Wh - W), (0, 0)))
    xs2d = (xh.reshape(N, Hh, 2, Wh, 2, C)
              .transpose(0, 1, 3, 2, 4, 5)
              .reshape(N, Hh, Wh, K)
              .astype(compute_dtype))

    # Phase-packed weights: a stride-2 3x3 conv over x_pad is exactly a
    # stride-1 2x2 conv over xs2d with 4*C input channels; (kh==3 or kw==3)
    # positions get zero weight.  K index layout = pr*2C + pc*C + c (matches
    # the xs2d channel layout above).
    wpad = jnp.pad(weight, ((0, 0), (0, 0), (0, 1), (0, 1)))      # (Cout, C, 4, 4)
    w2 = (wpad.reshape(Cout, C, 2, 2, 2, 2)                       # (co, c, dh, pr, dw, pc)
              .transpose(2, 4, 3, 5, 1, 0)                        # (dh, dw, pr, pc, c, co)
              .reshape(2, 2, K, Cout)
              .astype(compute_dtype))
    b2 = bias.reshape(1, Cout).astype(jnp.float32)

    out_flat = pl.pallas_call(
        _fused_conv_kernel,
        out_shape=jax.ShapeDtypeStruct((N, Ho * Wo, Cout), out_dtype),
        grid_spec=pltpu.PrefetchScalarGridSpec(
            num_scalar_prefetch=0,
            grid=(N,),
            in_specs=[
                pl.BlockSpec((1, Hh, Wh, K), lambda n: (n, 0, 0, 0)),
                pl.BlockSpec((2, 2, K, Cout), lambda n: (0, 0, 0, 0)),
                pl.BlockSpec((1, Cout), lambda n: (0, 0)),
            ],
            out_specs=pl.BlockSpec((1, Ho * Wo, Cout), lambda n: (n, 0, 0)),
        ),
        compiler_params=pltpu.CompilerParams(
            dimension_semantics=("parallel",),   # images shard across TCs on v7x
        ),
    )(xs2d, w2, b2)

    # Boundary layout fix-up runs only on the 4x-smaller output.
    out = out_flat.reshape(N, Ho, Wo, Cout).transpose(0, 3, 1, 2)
    return out


if __name__ == "__main__":
    N, C, H, W = 2, 4, 16, 16

    key = jax.random.PRNGKey(0)
    kx, kw, kb = jax.random.split(key, 3)

    x = jax.random.normal(kx, (N, C, H, W), jnp.float32)

    # Deterministic init mimicking nn.Conv2d default (uniform +/- 1/sqrt(fan_in)).
    fan_in = C * 3 * 3
    bound = 1.0 / (fan_in ** 0.5)
    weight = jax.random.uniform(kw, (C, C, 3, 3), jnp.float32, -bound, bound)
    bias = jax.random.uniform(kb, (C,), jnp.float32, -bound, bound)

    out = downsample_block(x, weight, bias)
    out = jax.block_until_ready(out)

    # Pure-JAX reference (same semantics as the PyTorch forward).
    xp = jnp.pad(x, ((0, 0), (0, 0), (0, 1), (0, 1)))
    ref = jax.lax.conv_general_dilated(
        xp, weight, window_strides=(2, 2), padding="VALID",
        dimension_numbers=("NCHW", "OIHW", "NCHW"),
    ) + bias[None, :, None, None]

    assert out.shape == (N, C, 8, 8), out.shape
    err = float(jnp.max(jnp.abs(out - ref)))
    assert jnp.allclose(out, ref, atol=1e-4, rtol=1e-4), err

    # Optional bf16-streamed / f32-accumulated path (v6e/v5e bandwidth option).
    out_bf16 = jax.block_until_ready(
        downsample_block(x, weight, bias, compute_dtype=jnp.bfloat16))
    assert jnp.allclose(out_bf16, ref, atol=5e-2, rtol=5e-2)

    print("KERNEL_OK")
</pallas_src>

<mosaic_0001>
module attributes {stable_mosaic.version = 11 : i64} {
  func.func @_fused_conv_kernel(%arg0: i32, %arg1: memref<1x9x9x16xf32, #tpu.memory_space<vmem>>, %arg2: memref<2x2x16x4xf32, #tpu.memory_space<vmem>>, %arg3: memref<1x4xf32, #tpu.memory_space<vmem>>, %arg4: memref<1x64x4xf32, #tpu.memory_space<vmem>>) attributes {dimension_semantics = [#tpu.dimension_semantics<parallel>], iteration_bounds = array<i64: 2>, scalar_prefetch = 0 : i64, scratch_operands = 0 : i64, tpu.core_type = #tpu.core_type<tc>, window_params = [{transform_indices = @transform_0, window_bounds = array<i64: 1, 9, 9, 16>}, {pipeline_mode = #tpu.pipeline_mode<synchronous>, transform_indices = @transform_1, window_bounds = array<i64: 2, 2, 16, 4>}, {pipeline_mode = #tpu.pipeline_mode<synchronous>, transform_indices = @transform_2, window_bounds = array<i64: 1, 4>}, {transform_indices = @transform_3, window_bounds = array<i64: 1, 64, 4>}]} {
    %c0 = arith.constant 0 : index
    %c0_0 = arith.constant 0 : index
    %c0_1 = arith.constant 0 : index
    %c0_2 = arith.constant 0 : index
    %0 = vector.load %arg1[%c0, %c0_0, %c0_1, %c0_2] : memref<1x9x9x16xf32, #tpu.memory_space<vmem>>, vector<1x9x9x16xf32>
    %1 = vector.shape_cast %0 : vector<1x9x9x16xf32> to vector<9x9x16xf32>
    %c0_3 = arith.constant 0 : index
    %c0_4 = arith.constant 0 : index
    %c0_5 = arith.constant 0 : index
    %c0_6 = arith.constant 0 : index
    %2 = vector.load %arg2[%c0_3, %c0_4, %c0_5, %c0_6] : memref<2x2x16x4xf32, #tpu.memory_space<vmem>>, vector<2x2x16x4xf32>
    %cst = arith.constant 0.000000e+00 : f32
    %3 = vector.broadcast %cst : f32 to vector<64x4xf32>
    %4 = vector.extract_strided_slice %1 {offsets = [0, 0, 0], sizes = [8, 8, 16], strides = [1, 1, 1]} : vector<9x9x16xf32> to vector<8x8x16xf32>
    %5 = vector.shape_cast %4 : vector<8x8x16xf32> to vector<64x16xf32>
    %6 = vector.extract_strided_slice %2 {offsets = [0, 0, 0, 0], sizes = [1, 1, 16, 4], strides = [1, 1, 1, 1]} : vector<2x2x16x4xf32> to vector<1x1x16x4xf32>
    %7 = vector.shape_cast %6 : vector<1x1x16x4xf32> to vector<16x4xf32>
    %cst_7 = arith.constant dense<0.000000e+00> : vector<64x4xf32>
    %8 = tpu.matmul %5, %7, %cst_7 {dimension_numbers = #tpu.dot_dimension_numbers<[1], [0], [0], [1], [0, 0, 1, 1], [], []>} : vector<64x16xf32>, vector<16x4xf32>, vector<64x4xf32> -> vector<64x4xf32>
    %9 = arith.addf %3, %8 : vector<64x4xf32>
    %10 = vector.extract_strided_slice %1 {offsets = [0, 1, 0], sizes = [8, 8, 16], strides = [1, 1, 1]} : vector<9x9x16xf32> to vector<8x8x16xf32>
    %11 = vector.shape_cast %10 : vector<8x8x16xf32> to vector<64x16xf32>
    %12 = vector.extract_strided_slice %2 {offsets = [0, 1, 0, 0], sizes = [1, 1, 16, 4], strides = [1, 1, 1, 1]} : vector<2x2x16x4xf32> to vector<1x1x16x4xf32>
    %13 = vector.shape_cast %12 : vector<1x1x16x4xf32> to vector<16x4xf32>
    %cst_8 = arith.constant dense<0.000000e+00> : vector<64x4xf32>
    %14 = tpu.matmul %11, %13, %cst_8 {dimension_numbers = #tpu.dot_dimension_numbers<[1], [0], [0], [1], [0, 0, 1, 1], [], []>} : vector<64x16xf32>, vector<16x4xf32>, vector<64x4xf32> -> vector<64x4xf32>
    %15 = arith.addf %9, %14 : vector<64x4xf32>
    %16 = vector.extract_strided_slice %1 {offsets = [1, 0, 0], sizes = [8, 8, 16], strides = [1, 1, 1]} : vector<9x9x16xf32> to vector<8x8x16xf32>
    %17 = vector.shape_cast %16 : vector<8x8x16xf32> to vector<64x16xf32>
    %18 = vector.extract_strided_slice %2 {offsets = [1, 0, 0, 0], sizes = [1, 1, 16, 4], strides = [1, 1, 1, 1]} : vector<2x2x16x4xf32> to vector<1x1x16x4xf32>
    %19 = vector.shape_cast %18 : vector<1x1x16x4xf32> to vector<16x4xf32>
    %cst_9 = arith.constant dense<0.000000e+00> : vector<64x4xf32>
    %20 = tpu.matmul %17, %19, %cst_9 {dimension_numbers = #tpu.dot_dimension_numbers<[1], [0], [0], [1], [0, 0, 1, 1], [], []>} : vector<64x16xf32>, vector<16x4xf32>, vector<64x4xf32> -> vector<64x4xf32>
    %21 = arith.addf %15, %20 : vector<64x4xf32>
    %22 = vector.extract_strided_slice %1 {offsets = [1, 1, 0], sizes = [8, 8, 16], strides = [1, 1, 1]} : vector<9x9x16xf32> to vector<8x8x16xf32>
    %23 = vector.shape_cast %22 : vector<8x8x16xf32> to vector<64x16xf32>
    %24 = vector.extract_strided_slice %2 {offsets = [1, 1, 0, 0], sizes = [1, 1, 16, 4], strides = [1, 1, 1, 1]} : vector<2x2x16x4xf32> to vector<1x1x16x4xf32>
    %25 = vector.shape_cast %24 : vector<1x1x16x4xf32> to vector<16x4xf32>
    %cst_10 = arith.constant dense<0.000000e+00> : vector<64x4xf32>
    %26 = tpu.matmul %23, %25, %cst_10 {dimension_numbers = #tpu.dot_dimension_numbers<[1], [0], [0], [1], [0, 0, 1, 1], [], []>} : vector<64x16xf32>, vector<16x4xf32>, vector<64x4xf32> -> vector<64x4xf32>
    %27 = arith.addf %21, %26 : vector<64x4xf32>
    %c0_11 = arith.constant 0 : index
    %c0_12 = arith.constant 0 : index
    %28 = vector.load %arg3[%c0_11, %c0_12] : memref<1x4xf32, #tpu.memory_space<vmem>>, vector<1x4xf32>
    %29 = vector.broadcast %28 : vector<1x4xf32> to vector<64x4xf32>
    %30 = arith.addf %27, %29 : vector<64x4xf32>
    %c0_13 = arith.constant 0 : index
    %c0_14 = arith.constant 0 : index
    %c0_15 = arith.constant 0 : index
    %31 = vector.load %arg4[%c0_13, %c0_14, %c0_15] : memref<1x64x4xf32, #tpu.memory_space<vmem>>, vector<1x64x4xf32>
    %32 = vector.shape_cast %31 : vector<1x64x4xf32> to vector<64x4xf32>
    %33 = vector.shape_cast %30 : vector<64x4xf32> to vector<1x64x4xf32>
    tpu.vector_store %arg4[%c0_13, %c0_14, %c0_15], %33 {strides = array<i32>} : memref<1x64x4xf32, #tpu.memory_space<vmem>>, vector<1x64x4xf32>,
    return
  }
  func.func @transform_0(%arg0: i32) -> (i32, i32, i32, i32) {
    %c0_i32 = arith.constant 0 : i32
    %c0_i32_0 = arith.constant 0 : i32
    %c0_i32_1 = arith.constant 0 : i32
    %c0_i32_2 = arith.constant 0 : i32
    return %arg0, %c0_i32, %c0_i32_0, %c0_i32_1 : i32, i32, i32, i32
  }
  func.func @transform_1(%arg0: i32) -> (i32, i32, i32, i32) {
    %c0_i32 = arith.constant 0 : i32
    %c0_i32_0 = arith.constant 0 : i32
    %c0_i32_1 = arith.constant 0 : i32
    %c0_i32_2 = arith.constant 0 : i32
    %c0_i32_3 = arith.constant 0 : i32
    return %c0_i32, %c0_i32_0, %c0_i32_1, %c0_i32_2 : i32, i32, i32, i32
  }
  func.func @transform_2(%arg0: i32) -> (i32, i32) {
    %c0_i32 = arith.constant 0 : i32
    %c0_i32_0 = arith.constant 0 : i32
    %c0_i32_1 = arith.constant 0 : i32
    return %c0_i32, %c0_i32_0 : i32, i32
  }
  func.func @transform_3(%arg0: i32) -> (i32, i32, i32) {
    %c0_i32 = arith.constant 0 : i32
    %c0_i32_0 = arith.constant 0 : i32
    %c0_i32_1 = arith.constant 0 : i32
    return %arg0, %c0_i32, %c0_i32_0 : i32, i32, i32
  }
}

</mosaic_0001>

<bundles_post_ra>
// kernel: downsample_block.1
= control target key start
LH: loop header
LB: loop body
LE: loop exit
PB: predicated region body
PF: predicated region fallthrough
CT: control target
= control target key end

     0   :  { %s980_s12 = smov 0   ;;  %s1107_s0 = inlined_call_operand.vmem [shape: f32[2,9,9,16], index: 0, kind: input, shape index: {}]   ;;  %s1108_s1 = inlined_call_operand.vmem [shape: f32[2,2,16,4], index: 1, kind: input, shape index: {}]   ;;  %s1109_s2 = inlined_call_operand.vmem [shape: f32[1,4], index: 2, kind: input, shape index: {}]   ;;  %s1110_s3 = inlined_call_operand.vmem [shape: f32[2,64,4], index: 3, kind: output, shape index: {}]  }
   0x1 LB: > { %s795_s13 = sadd.s32 4294967295, %s958_s12   ;;  %p799_p0 = scmp.ge.s32.totalorder %s958_s12, 1  ;;  %s958_s12 = sphi %s980_s12, %s13_s12  }
   0x2   : > { %p137_p1 = scmp.lt.s32.totalorder %s958_s12, 3 }
   0x4   : > { %p138_p2 = pnand %p799_p0, %p137_p1 }
   0x5   : > { %p161_p3 = scmp.lt.s32.totalorder (!%p138_p2), %s795_s13, 1 }
   0x6   : > { %141 = sbr.rel (%p138_p2) target bundleno = 251 (0xfb), region = 32 }
   0xb   : > { %v192_v0 = vld [vmem:[%s1108_s1 + $0x18] sm:$0xff]  ;;  %v190_v1 = vld [vmem:[%s1108_s1 + $0x8] sm:$0xff]  ;;  %v191_v2 = vld [vmem:[%s1108_s1 + $0x10] sm:$0xff]  ;;  %s1112_s13 = smov (!%p161_p3, %s795_s13), 1  ;;  %vm238_vm0 = vcmask 130048   ;;  %vm213_vm1 = vcmask 1046528  }
   0xc   : > { %879 = vmatprep.subr.mxu0 %v192_v0  ;;  %895 = vmatprep.subr.mxu1 %v190_v1  ;;  %v189_v3 = vld [vmem:[%s1108_s1] sm:$0xff]  ;;  %v194_v4 = vld [vmem:[%s1108_s1 + $0x28] sm:$0xff]  ;;  %v196_v5 = vld [vmem:[%s1108_s1 + $0x38] sm:$0xff]  ;;  %s943_s26 = smul.u32 144, %s1112_s13  ;;  %s838_s7 = sshll.u32 %s1112_s13, 6  ;;  %vm731_vm2 = vcmask 31744  }
   0xd   : > { %880 = vmatpush3.msra.mxu0 %v192_v0  ;;  %896 = vmatpush3.msra.mxu1 %v190_v1  ;;  %v195_v6 = vld [vmem:[%s1108_s1 + $0x30] sm:$0xff]  ;;  %v193_v20 = vld [vmem:[%s1108_s1 + $0x20] sm:$0xff]  ;;  %s1086_s14 = scalar_lea.vmem %s1110_s3, %s838_s7 }
   0xe   : > { %881 = vmatprep.subr.mxu0 %v191_v2  ;;  %897 = vmatprep.subr.mxu1 %v189_v3  ;;  %s1012_s29 = scalar_lea.vmem %s1107_s0, %s943_s26 }
   0xf   : > { %882 = vmatpush3.msra.mxu0 %v191_v2  ;;  %898 = vmatpush3.msra.mxu1 %v189_v3  ;;  %v171_v7 = vld [vmem:[%s1012_s29] sm:$0xff]  ;;  %v172_v8 = vld [vmem:[%s1012_s29 + $0x8] sm:$0x1]  ;;  %v173_v9 = vld [vmem:[%s1012_s29 + $0x10] sm:$0xff] }
  0x10   : > { %911 = vmatprep.subr.mxu0 %v194_v4  ;;  %927 = vmatprep.subr.mxu1 %v196_v5  ;;  %v214_v10 = vrot.slane %v171_v7, 1  ;;  %v215_v11 = vrot.slane %v172_v8, 1  ;;  %v174_v12 = vld [vmem:[%s1012_s29 + $0x18] sm:$0x1]  ;;  %v217_v13 = vrot.slane %v173_v9, 1  ;;  %v175_v14 = vld [vmem:[%s1012_s29 + $0x20] sm:$0xff] }
  0x11   : > { %899 = vmatprep.mubr.msk.f32.mxu1 %vm238_vm0, %v171_v7  ;;  %v218_v15 = vrot.slane %v174_v12, 1  ;;  %v176_v16 = vld [vmem:[%s1012_s29 + $0x28] sm:$0x1]  ;;  %v220_v17 = vrot.slane %v175_v14, 1  ;;  %v177_v18 = vld [vmem:[%s1012_s29 + $0x30] sm:$0xff]  ;;  %v179_v19 = vld [vmem:[%s1012_s29 + $0x40] sm:$0xff] }
  0x12   : > { %900 = vmatmul.mubr.msk.f32.vlgmr.msra.gmra.mxu1 %vm238_vm0, %v173_v9  ;;  %v216_v21 = vsel %vm213_vm1, %v214_v10, %v215_v11  ;;  %v221_v22 = vrot.slane %v176_v16, 1  ;;  %v178_v23 = vld [vmem:[%s1012_s29 + $0x38] sm:$0x1]  ;;  %v223_v24 = vrot.slane %v177_v18, 1  ;;  %v180_v25 = vld [vmem:[%s1012_s29 + $0x48] sm:$0x1] }
  0x13   : > { %928 = vmatpush3.msra.mxu1 %v196_v5  ;;  %902 = vmatprep.mubr.msk.f32.mxu1 %vm238_vm0, %v175_v14  ;;  %v219_v26 = vsel %vm213_vm1, %v217_v13, %v218_v15  ;;  %v224_v27 = vrot.slane %v178_v23, 1  ;;  %v226_v28 = vrot.slane %v179_v19, 1  ;;  %v227_v29 = vrot.slane %v180_v25, 1  ;;  %v181_v30 = vld [vmem:[%s1012_s29 + $0x50] sm:$0xff]  ;;  %v182_v31 = vld [vmem:[%s1012_s29 + $0x58] sm:$0x1] }
  0x14   : > { %883 = vmatprep.mubr.msk.f32.mxu0 %vm238_vm0, %v216_v21  ;;  %929 = vmatprep.subr.mxu1 %v195_v6  ;;  %v222_v32 = vsel %vm213_vm1, %v220_v17, %v221_v22  ;;  %v183_v33 = vld [vmem:[%s1012_s29 + $0x60] sm:$0xff]  ;;  %v184_v34 = vld [vmem:[%s1012_s29 + $0x68] sm:$0x1]  ;;  %v229_v36 = vrot.slane %v181_v30, 1  ;;  %v230_v37 = vrot.slane %v182_v31, 1  ;;  %v185_v41 = vld [vmem:[%s1012_s29 + $0x70] sm:$0xff] }
  0x15   : > { %884 = vmatmul.mubr.msk.f32.vlgmr.msra.gmra.mxu0 %vm238_vm0, %v219_v26  ;;  %930 = vmatpush3.msra.mxu1 %v195_v6  ;;  %v225_v35 = vsel %vm213_vm1, %v223_v24, %v224_v27  ;;  %v228_v38 = vsel %vm213_vm1, %v226_v28, %v227_v29  ;;  %v232_v39 = vrot.slane %v183_v33, 1  ;;  %v233_v40 = vrot.slane %v184_v34, 1  ;;  %v186_v42 = vld [vmem:[%s1012_s29 + $0x78] sm:$0x1]  ;;  %v187_v48 = vld [vmem:[%s1012_s29 + $0x80] sm:$0xff] }
  0x16   : > { %912 = vmatpush3.msra.mxu0 %v194_v4  ;;  %886 = vmatprep.mubr.msk.f32.mxu0 %vm238_vm0, %v222_v32  ;;  %v231_v43 = vsel %vm213_vm1, %v229_v36, %v230_v37  ;;  %v235_v44 = vrot.slane %v185_v41, 1  ;;  %v236_v45 = vrot.slane %v186_v42, 1  ;;  %v188_v49 = vld [vmem:[%s1012_s29 + $0x88] sm:$0x1]  ;;  %v598_v50 = vrot.slane %v187_v48, 1 }
  0x17   : > { %903 = vmatmul.mubr.msk.f32.gmra.mxu1 %vm238_vm0, %v177_v18  ;;  %913 = vmatprep.subr.mxu0 %v193_v20  ;;  %v234_v46 = vsel %vm213_vm1, %v232_v39, %v233_v40  ;;  %v599_v51 = vrot.slane %v188_v49, 1  ;;  %v835_v11 = vld [vmem:[%s1109_s2] ss:$0 sm:$0xff] }
  0x18   : > { %905 = vmatprep.mubr.msk.f32.mxu1 %vm238_vm0, %v179_v19  ;;  %914 = vmatpush3.msra.mxu0 %v193_v20  ;;  %v237_v47 = vsel %vm213_vm1, %v235_v44, %v236_v45 }
  0x19   : > { %887 = vmatmul.mubr.msk.f32.gmra.mxu0 %vm238_vm0, %v225_v35  ;;  %v600_v52 = vsel %vm213_vm1, %v598_v50, %v599_v51 }
  0x1a   : > { %889 = vmatprep.mubr.msk.f32.mxu0 %vm238_vm0, %v228_v38 }
  0x1b   : > { %906 = vmatmul.mubr.msk.f32.gmra.mxu1 %vm238_vm0, %v181_v30 }
  0x1c   : > { %908 = vmatprep.mubr.msk.f32.mxu1 %vm238_vm0, %v183_v33 }
  0x1d   : > { %890 = vmatmul.mubr.msk.f32.gmra.mxu0 %vm238_vm0, %v231_v43 }
  0x1e   : > { %892 = vmatprep.mubr.msk.f32.mxu0 %vm238_vm0, %v234_v46 }
  0x1f   : > { %909 = vmatmul.mubr.msk.f32.gmra.mxu1 %vm238_vm0, %v185_v41 }
  0x20   : > { %931 = vmatprep.mubr.msk.f32.mxu1 %vm238_vm0, %v219_v26 }
  0x21   : > { %893 = vmatmul.mubr.msk.f32.gmra.mxu0 %vm238_vm0, %v237_v47 }
  0x22   : > { %915 = vmatprep.mubr.msk.f32.mxu0 %vm238_vm0, %v173_v9 }
  0x23   : > { %932 = vmatmul.mubr.msk.f32.vlgmr.msra.gmra.mxu1 %vm238_vm0, %v222_v32 }
  0x24   : > { %934 = vmatprep.mubr.msk.f32.mxu1 %vm238_vm0, %v225_v35 }
  0x25   : > { %916 = vmatmul.mubr.msk.f32.vlgmr.msra.gmra.mxu0 %vm238_vm0, %v175_v14 }
  0x26   : > { %918 = vmatprep.mubr.msk.f32.mxu0 %vm238_vm0, %v177_v18 }
  0x27   : > { %935 = vmatmul.mubr.msk.f32.gmra.mxu1 %vm238_vm0, %v228_v38 }
  0x28   : > { %937 = vmatprep.mubr.msk.f32.mxu1 %vm238_vm0, %v231_v43 }
  0x29   : > { %919 = vmatmul.mubr.msk.f32.gmra.mxu0 %vm238_vm0, %v179_v19 }
  0x2a   : > { %921 = vmatprep.mubr.msk.f32.mxu0 %vm238_vm0, %v181_v30 }
  0x2b   : > { %938 = vmatmul.mubr.msk.f32.gmra.mxu1 %vm238_vm0, %v234_v46 }
  0x2c   : > { %940 = vmatprep.mubr.msk.f32.mxu1 %vm238_vm0, %v237_v47 }
  0x2d   : > { %922 = vmatmul.mubr.msk.f32.gmra.mxu0 %vm238_vm0, %v183_v33 }
  0x2e   : > { %924 = vmatprep.mubr.msk.f32.mxu0 %vm238_vm0, %v185_v41 }
  0x2f   : > { %941 = vmatmul.mubr.msk.f32.gmra.mxu1 %vm238_vm0, %v600_v52 }
  0x31   : > { %925 = vmatmul.mubr.msk.f32.gmra.mxu0 %vm238_vm0, %v187_v48 }
  0xd2   : > { %v901_v53 = vpop.f32.mrf.mxu1 }
  0xd4   : > { %v442_v54 = vpop.f32.mrf.mxu1 }
  0xd5   : > { %v885_v55 = vpop.f32.mrf.mxu0 }
  0xd6   : > { %v448_v6 = vadd.f32 %v901_v53, %v885_v55 }
  0xd7   : > { %v321_v56 = vpop.f32.mrf.mxu0  ;;  %v904_v57 = vpop.f32.mrf.mxu1 }
  0xd8   : > { %v443_v9 = vadd.f32 %v442_v54, %v321_v56 }
  0xd9   : > { %v888_v58 = vpop.f32.mrf.mxu0  ;;  %v452_v59 = vpop.f32.mrf.mxu1 }
  0xda   : > { %v458_v14 = vadd.f32 %v904_v57, %v888_v58 }
  0xdb   : > { %v331_v60 = vpop.f32.mrf.mxu0  ;;  %v907_v61 = vpop.f32.mrf.mxu1 }
  0xdc   : > { %v453_v19 = vadd.f32 %v452_v59, %v331_v60 }
  0xdd   : > { %v891_v62 = vpop.f32.mrf.mxu0  ;;  %v462_v63 = vpop.f32.mrf.mxu1 }
  0xde   : > { %v468_v25 = vadd.f32 %v907_v61, %v891_v62 }
  0xdf   : > { %v341_v0 = vpop.f32.mrf.mxu0  ;;  %v910_v1 = vpop.f32.mrf.mxu1 }
  0xe0   : > { %v463_v31 = vadd.f32 %v462_v63, %v341_v0 }
  0xe1   : > { %v894_v2 = vpop.f32.mrf.mxu0  ;;  %v472_v3 = vpop.f32.mrf.mxu1 }
  0xe2   : > { %v478_v36 = vadd.f32 %v910_v1, %v894_v2 }
  0xe3   : > { %v351_v4 = vpop.f32.mrf.mxu0  ;;  %v933_v5 = vpop.f32.mrf.mxu1 }
  0xe4   : > { %v473_v42 = vadd.f32 %v472_v3, %v351_v4 }
  0xe5   : > { %v917_v7 = vpop.f32.mrf.mxu0  ;;  %v669_v8 = vpop.f32.mrf.mxu1 }
  0xe6   : > { %v590_v10 = vadd.f32 %v917_v7, %v448_v6 }
  0xe7   : > { %v550_v12 = vpop.f32.mrf.mxu0  ;;  %v936_v13 = vpop.f32.mrf.mxu1 }
  0xe8   : > { %v709_v15 = vadd.f32 %v933_v5, %v590_v10  ;;  %v589_v16 = vadd.f32 %v550_v12, %v443_v9 }
  0xe9   : > { %v920_v17 = vpop.f32.mrf.mxu0  ;;  %v679_v18 = vpop.f32.mrf.mxu1 }
  0xea   : > { %v724_v20 = vadd.f32 %v835_v11, %v709_v15  ;;  %v708_v21 = vadd.f32 %v669_v8, %v589_v16  ;;  %v592_v22 = vadd.f32 %v920_v17, %v458_v14 }
  0xeb   : > { %v560_v23 = vpop.f32.mrf.mxu0  ;;  %v939_v24 = vpop.f32.mrf.mxu1 }
  0xec   : > { %733 = vst.msk [vmem:[%s1086_s14 + $0x8] sm:$0xff] %vm731_vm2, %v724_v20  ;;  %v723_v26 = vadd.f32 %v835_v11, %v708_v21  ;;  %v711_v27 = vadd.f32 %v936_v13, %v592_v22  ;;  %v591_v28 = vadd.f32 %v560_v23, %v453_v19 }
  0xed   : > { %v923_v29 = vpop.f32.mrf.mxu0  ;;  %v689_v30 = vpop.f32.mrf.mxu1 }
  0xee   : > { %732 = vst.msk [vmem:[%s1086_s14] sm:$0xff] %vm731_vm2, %v723_v26  ;;  %v726_v32 = vadd.f32 %v835_v11, %v711_v27  ;;  %v710_v33 = vadd.f32 %v679_v18, %v591_v28  ;;  %v594_v34 = vadd.f32 %v923_v29, %v468_v25 }
  0xef   : > { %v570_v35 = vpop.f32.mrf.mxu0  ;;  %v942_v41 = vpop.f32.mrf.mxu1 }
  0xf0   : > { %735 = vst.msk [vmem:[%s1086_s14 + $0x18] sm:$0xff] %vm731_vm2, %v726_v32  ;;  %v725_v37 = vadd.f32 %v835_v11, %v710_v33  ;;  %v713_v38 = vadd.f32 %v939_v24, %v594_v34  ;;  %v593_v39 = vadd.f32 %v570_v35, %v463_v31 }
  0xf1   : > { %v926_v40 = vpop.f32.mrf.mxu0  ;;  %v699_v50 = vpop.f32.mrf.mxu1 }
  0xf2   : > { %734 = vst.msk [vmem:[%s1086_s14 + $0x10] sm:$0xff] %vm731_vm2, %v725_v37  ;;  %v728_v43 = vadd.f32 %v835_v11, %v713_v38  ;;  %v712_v44 = vadd.f32 %v689_v30, %v593_v39  ;;  %v596_v45 = vadd.f32 %v926_v40, %v478_v36 }
  0xf3   : > { %v580_v46 = vpop.f32.mrf.mxu0 }
  0xf4   : > { %737 = vst.msk [vmem:[%s1086_s14 + $0x28] sm:$0xff] %vm731_vm2, %v728_v43  ;;  %v727_v47 = vadd.f32 %v835_v11, %v712_v44  ;;  %v715_v48 = vadd.f32 %v942_v41, %v596_v45  ;;  %v595_v49 = vadd.f32 %v580_v46, %v473_v42 }
  0xf6   : > { %736 = vst.msk [vmem:[%s1086_s14 + $0x20] sm:$0xff] %vm731_vm2, %v727_v47  ;;  %v730_v51 = vadd.f32 %v835_v11, %v715_v48  ;;  %v714_v52 = vadd.f32 %v699_v50, %v595_v49 }
  0xf8   : > { %739 = vst.msk [vmem:[%s1086_s14 + $0x38] sm:$0xff] %vm731_vm2, %v730_v51  ;;  %v729_v53 = vadd.f32 %v835_v11, %v714_v52 }
  0xfa   : > { %738 = vst.msk [vmem:[%s1086_s14 + $0x30] sm:$0xff] %vm731_vm2, %v729_v53 }
  0xfb PF: > { %s13_s12 = sadd.s32 1, %s958_s12  }
  0xfc   : > { %p10_p4 = scmp.ge.s32.totalorder %s13_s12, 4  }
  0xfe   :  { %12 = sbr.rel (!%p10_p4) target bundleno = 1 (0x1), region = 62 }

</bundles_post_ra>
